<compile_context>
chip_gen: v7x
topology: tpu7x:2x2x1
jax: 0.10.0
libtpu: 0.0.40
codegen_flags: <defaults>
</compile_context>

<pallas_src>
import jax
import jax.numpy as jnp
from jax.experimental import pallas as pl
from jax.experimental.pallas import tpu as pltpu

_LANE = 128


def _round_up(n, m):
    return ((n + m - 1) // m) * m


def _mlp_kernel(x_ref,
                w1_ref, b1_ref,
                w2_ref, b2_ref,
                w3_ref, b3_ref,
                w4_ref, b4_ref,
                w5_ref, b5_ref,
                o_ref):
    """5-layer MLP tile: bf16 MXU matmuls (f32 accum), single-EUP sigmoid, softmax head."""

    def dense(h, w_ref, b_ref):
        # bf16 operands into the MXU, f32 accumulation; bias is a (1, N) f32 row.
        return jnp.dot(h.astype(jnp.bfloat16), w_ref[...],
                       preferred_element_type=jnp.float32) + b_ref[...]

    def sigmoid(z):
        # One EUP transcendental per activation (vs exp + reciprocal), and exact.
        return 0.5 * jnp.tanh(0.5 * z) + 0.5

    h = x_ref[...]                               # (TILE_B, 784) bf16
    h = sigmoid(dense(h, w1_ref, b1_ref))        # (TILE_B, 256) f32
    h = sigmoid(dense(h, w2_ref, b2_ref))        # (TILE_B, 128)
    h = sigmoid(dense(h, w3_ref, b3_ref))        # (TILE_B, 128)
    h = sigmoid(dense(h, w4_ref, b4_ref))        # (TILE_B, 128)
    logits = dense(h, w5_ref, b5_ref)            # (TILE_B, 128); padded cols bias = -1e30

    # F.softmax over the class axis. Padded columns have -1e30 logits -> exp == 0,
    # so they never leak into the denominator.
    m = jnp.max(logits, axis=-1, keepdims=True)
    e = jnp.exp(logits - m)
    probs = e * pl.reciprocal(jnp.sum(e, axis=-1, keepdims=True), approx=True)
    o_ref[...] = probs.astype(o_ref.dtype)       # bf16 store -> half the output HBM bytes


def nn_forward(x, params, tile_b=512, out_dtype=jnp.bfloat16):
    """x: (B, C, H, W) or (B, D).  params: list of (W_t (in,out), b (out,)) float32."""
    x2d = x.reshape(x.shape[0], -1)
    batch, d_in = x2d.shape
    num_classes = params[-1][0].shape[1]

    # ---- batch tiling: large (>=~512) tiles, right-sized to hug the real batch, ----
    # ---- and >=2 grid steps whenever possible so both v7x TensorCores get work. ----
    target = max(8, int(tile_b))
    num_tiles = max(1, -(-batch // target))
    if num_tiles < 2 and batch >= 16:
        num_tiles = 2
    tile_rows = _round_up(-(-batch // num_tiles), 8)
    b_pad = tile_rows * num_tiles

    # ---- input: cast + batch-pad fused into one op; feature dim stays at d_in ----
    # (block last dim == full array dim is legal, so no lane padding of the input).
    x_p = jnp.pad(x2d.astype(jnp.bfloat16), ((0, b_pad - batch), (0, 0)))

    # ---- lane-pad weights/biases; weights bf16, biases f32 as (1, out_p) rows ----
    flat_params = []
    in_specs = [pl.BlockSpec((tile_rows, d_in), lambda i: (i, 0))]
    prev_p = d_in
    for li, (w, b) in enumerate(params):
        fan_in, fan_out = w.shape
        out_p = _round_up(fan_out, _LANE)
        w_p = jnp.zeros((prev_p, out_p), jnp.bfloat16).at[:fan_in, :fan_out].set(
            w.astype(jnp.bfloat16))
        # Last layer: padded class columns get -1e30 bias so softmax zeros them.
        # Hidden layers: padded units (sigmoid(0)=0.5) hit zero weight rows downstream.
        fill = -1e30 if li == len(params) - 1 else 0.0
        b_p = jnp.full((1, out_p), fill, jnp.float32).at[0, :fan_out].set(
            b.reshape(-1).astype(jnp.float32))
        flat_params += [w_p, b_p]
        # Constant index_map -> fetched once, VMEM-resident across all grid steps.
        in_specs += [pl.BlockSpec((prev_p, out_p), lambda i: (0, 0)),
                     pl.BlockSpec((1, out_p), lambda i: (0, 0))]
        prev_p = out_p

    out_p = prev_p
    grid = (num_tiles,)

    weight_arrays = flat_params[::2]
    out_itemsize = jnp.dtype(out_dtype).itemsize
    flops = 2 * b_pad * sum(wp.shape[0] * wp.shape[1] for wp in weight_arrays)
    transcendentals = b_pad * (sum(wp.shape[1] for wp in weight_arrays) + out_p)
    bytes_accessed = (x_p.size * x_p.dtype.itemsize
                      + sum(p.size * p.dtype.itemsize for p in flat_params)
                      + b_pad * out_p * out_itemsize)

    # ---- VMEM: size the scoped limit to the actual working set (x2 headroom), ----
    # ---- instead of a blanket 32 MiB (keeps scoped VMEM free on v5e).          ----
    param_bytes = sum(int(p.size) * p.dtype.itemsize for p in flat_params)
    max_hidden = max(wp.shape[1] for wp in weight_arrays)
    working = (param_bytes
               + 2 * tile_rows * d_in * 2              # double-buffered input tile
               + 2 * tile_rows * out_p * out_itemsize  # double-buffered output tile
               + 6 * tile_rows * max_hidden * 4)       # f32 activation headroom
    vmem_limit = int(min(max(2 * working, 8 * 1024 * 1024), 64 * 1024 * 1024))

    out_padded = pl.pallas_call(
        _mlp_kernel,
        out_shape=jax.ShapeDtypeStruct((b_pad, out_p), out_dtype),
        grid=grid,
        in_specs=in_specs,
        out_specs=pl.BlockSpec((tile_rows, out_p), lambda i: (i, 0)),
        compiler_params=pltpu.CompilerParams(
            dimension_semantics=("parallel",),
            vmem_limit_bytes=vmem_limit),
        cost_estimate=pl.CostEstimate(
            flops=flops,
            transcendentals=transcendentals,
            bytes_accessed=bytes_accessed),
    )(x_p, *flat_params)

    # Strip batch/class padding; hand back f32 (matching the torch module's dtype).
    return out_padded[:batch, :num_classes].astype(jnp.float32)


def init_params(key, input_size, num_classes):
    """Deterministic init mimicking nn.Linear default (U(-1/sqrt(fan_in), +1/sqrt(fan_in)))."""
    sizes = [input_size, 200, 100, 60, 30, num_classes]
    params = []
    for i in range(5):
        fan_in, fan_out = sizes[i], sizes[i + 1]
        key, kw, kb = jax.random.split(key, 3)
        bound = 1.0 / jnp.sqrt(jnp.float32(fan_in))
        # stored transposed: (in, out)
        w = jax.random.uniform(kw, (fan_in, fan_out), jnp.float32, -bound, bound)
        b = jax.random.uniform(kb, (fan_out,), jnp.float32, -bound, bound)
        params.append((w, b))
    return params


def _reference(x, params):
    """Pure-JAX f32 reference matching the PyTorch forward."""
    h = x.reshape(x.shape[0], -1).astype(jnp.float32)
    for i, (w, b) in enumerate(params):
        h = h @ w + b
        if i < len(params) - 1:
            h = jax.nn.sigmoid(h)
    return jax.nn.softmax(h, axis=-1)


if __name__ == "__main__":
    key = jax.random.PRNGKey(0)
    k_x, k_p = jax.random.split(key)

    batch, input_size, num_classes = 4, 784, 10     # MNIST: 1x28x28 -> 784
    x = jax.random.normal(k_x, (batch, 1, 28, 28), jnp.float32)

    params = init_params(k_p, input_size, num_classes)

    out = jax.jit(nn_forward)(x, params)
    out = jax.block_until_ready(out)

    ref = _reference(x, params)
    assert out.shape == (batch, num_classes)
    assert jnp.allclose(jnp.sum(out, axis=-1), 1.0, atol=5e-3)
    assert jnp.allclose(out, ref, atol=2e-2)
    print("KERNEL_OK")
</pallas_src>

<mosaic_0001>
module attributes {stable_mosaic.version = 11 : i64} {
  func.func @_mlp_kernel(%arg0: i32, %arg1: memref<8x784xbf16, #tpu.memory_space<vmem>>, %arg2: memref<784x256xbf16, #tpu.memory_space<vmem>>, %arg3: memref<1x256xf32, #tpu.memory_space<vmem>>, %arg4: memref<256x128xbf16, #tpu.memory_space<vmem>>, %arg5: memref<1x128xf32, #tpu.memory_space<vmem>>, %arg6: memref<128x128xbf16, #tpu.memory_space<vmem>>, %arg7: memref<1x128xf32, #tpu.memory_space<vmem>>, %arg8: memref<128x128xbf16, #tpu.memory_space<vmem>>, %arg9: memref<1x128xf32, #tpu.memory_space<vmem>>, %arg10: memref<128x128xbf16, #tpu.memory_space<vmem>>, %arg11: memref<1x128xf32, #tpu.memory_space<vmem>>, %arg12: memref<8x128xbf16, #tpu.memory_space<vmem>>) attributes {dimension_semantics = [#tpu.dimension_semantics<parallel>], iteration_bounds = array<i64: 1>, scalar_prefetch = 0 : i64, scratch_operands = 0 : i64, tpu.core_type = #tpu.core_type<tc>, window_params = [{transform_indices = @transform_0, window_bounds = array<i64: 8, 784>}, {pipeline_mode = #tpu.pipeline_mode<synchronous>, transform_indices = @transform_1, window_bounds = array<i64: 784, 256>}, {pipeline_mode = #tpu.pipeline_mode<synchronous>, transform_indices = @transform_2, window_bounds = array<i64: 1, 256>}, {pipeline_mode = #tpu.pipeline_mode<synchronous>, transform_indices = @transform_3, window_bounds = array<i64: 256, 128>}, {pipeline_mode = #tpu.pipeline_mode<synchronous>, transform_indices = @transform_4, window_bounds = array<i64: 1, 128>}, {pipeline_mode = #tpu.pipeline_mode<synchronous>, transform_indices = @transform_5, window_bounds = array<i64: 128, 128>}, {pipeline_mode = #tpu.pipeline_mode<synchronous>, transform_indices = @transform_6, window_bounds = array<i64: 1, 128>}, {pipeline_mode = #tpu.pipeline_mode<synchronous>, transform_indices = @transform_7, window_bounds = array<i64: 128, 128>}, {pipeline_mode = #tpu.pipeline_mode<synchronous>, transform_indices = @transform_8, window_bounds = array<i64: 1, 128>}, {pipeline_mode = #tpu.pipeline_mode<synchronous>, transform_indices = @transform_9, window_bounds = array<i64: 128, 128>}, {pipeline_mode = #tpu.pipeline_mode<synchronous>, transform_indices = @transform_10, window_bounds = array<i64: 1, 128>}, {transform_indices = @transform_11, window_bounds = array<i64: 8, 128>}]} {
    %c0 = arith.constant 0 : index
    %c0_0 = arith.constant 0 : index
    %0 = vector.load %arg1[%c0, %c0_0] : memref<8x784xbf16, #tpu.memory_space<vmem>>, vector<8x784xbf16>
    %c0_1 = arith.constant 0 : index
    %c0_2 = arith.constant 0 : index
    %1 = vector.load %arg2[%c0_1, %c0_2] : memref<784x256xbf16, #tpu.memory_space<vmem>>, vector<784x256xbf16>
    %cst = arith.constant dense<0.000000e+00> : vector<8x256xf32>
    %2 = tpu.matmul %0, %1, %cst {dimension_numbers = #tpu.dot_dimension_numbers<[1], [0], [0], [1], [0, 0, 1, 1], [], []>} : vector<8x784xbf16>, vector<784x256xbf16>, vector<8x256xf32> -> vector<8x256xf32>
    %c0_3 = arith.constant 0 : index
    %c0_4 = arith.constant 0 : index
    %3 = vector.load %arg3[%c0_3, %c0_4] : memref<1x256xf32, #tpu.memory_space<vmem>>, vector<1x256xf32>
    %4 = vector.broadcast %3 : vector<1x256xf32> to vector<8x256xf32>
    %5 = arith.addf %2, %4 : vector<8x256xf32>
    %cst_5 = arith.constant 5.000000e-01 : f32
    %6 = vector.broadcast %cst_5 : f32 to vector<8x256xf32>
    %7 = arith.mulf %6, %5 : vector<8x256xf32>
    %8 = math.tanh %7 : vector<8x256xf32>
    %cst_6 = arith.constant 5.000000e-01 : f32
    %9 = vector.broadcast %cst_6 : f32 to vector<8x256xf32>
    %10 = arith.mulf %9, %8 : vector<8x256xf32>
    %cst_7 = arith.constant 5.000000e-01 : f32
    %11 = vector.broadcast %cst_7 : f32 to vector<8x256xf32>
    %12 = arith.addf %10, %11 : vector<8x256xf32>
    %13 = arith.truncf %12 : vector<8x256xf32> to vector<8x256xbf16>
    %c0_8 = arith.constant 0 : index
    %c0_9 = arith.constant 0 : index
    %14 = vector.load %arg4[%c0_8, %c0_9] : memref<256x128xbf16, #tpu.memory_space<vmem>>, vector<256x128xbf16>
    %cst_10 = arith.constant dense<0.000000e+00> : vector<8x128xf32>
    %15 = tpu.matmul %13, %14, %cst_10 {dimension_numbers = #tpu.dot_dimension_numbers<[1], [0], [0], [1], [0, 0, 1, 1], [], []>} : vector<8x256xbf16>, vector<256x128xbf16>, vector<8x128xf32> -> vector<8x128xf32>
    %c0_11 = arith.constant 0 : index
    %c0_12 = arith.constant 0 : index
    %16 = vector.load %arg5[%c0_11, %c0_12] : memref<1x128xf32, #tpu.memory_space<vmem>>, vector<1x128xf32>
    %17 = vector.broadcast %16 : vector<1x128xf32> to vector<8x128xf32>
    %18 = arith.addf %15, %17 : vector<8x128xf32>
    %cst_13 = arith.constant 5.000000e-01 : f32
    %19 = vector.broadcast %cst_13 : f32 to vector<8x128xf32>
    %20 = arith.mulf %19, %18 : vector<8x128xf32>
    %21 = math.tanh %20 : vector<8x128xf32>
    %cst_14 = arith.constant 5.000000e-01 : f32
    %22 = vector.broadcast %cst_14 : f32 to vector<8x128xf32>
    %23 = arith.mulf %22, %21 : vector<8x128xf32>
    %cst_15 = arith.constant 5.000000e-01 : f32
    %24 = vector.broadcast %cst_15 : f32 to vector<8x128xf32>
    %25 = arith.addf %23, %24 : vector<8x128xf32>
    %26 = arith.truncf %25 : vector<8x128xf32> to vector<8x128xbf16>
    %c0_16 = arith.constant 0 : index
    %c0_17 = arith.constant 0 : index
    %27 = vector.load %arg6[%c0_16, %c0_17] : memref<128x128xbf16, #tpu.memory_space<vmem>>, vector<128x128xbf16>
    %cst_18 = arith.constant dense<0.000000e+00> : vector<8x128xf32>
    %28 = tpu.matmul %26, %27, %cst_18 {dimension_numbers = #tpu.dot_dimension_numbers<[1], [0], [0], [1], [0, 0, 1, 1], [], []>} : vector<8x128xbf16>, vector<128x128xbf16>, vector<8x128xf32> -> vector<8x128xf32>
    %c0_19 = arith.constant 0 : index
    %c0_20 = arith.constant 0 : index
    %29 = vector.load %arg7[%c0_19, %c0_20] : memref<1x128xf32, #tpu.memory_space<vmem>>, vector<1x128xf32>
    %30 = vector.broadcast %29 : vector<1x128xf32> to vector<8x128xf32>
    %31 = arith.addf %28, %30 : vector<8x128xf32>
    %cst_21 = arith.constant 5.000000e-01 : f32
    %32 = vector.broadcast %cst_21 : f32 to vector<8x128xf32>
    %33 = arith.mulf %32, %31 : vector<8x128xf32>
    %34 = math.tanh %33 : vector<8x128xf32>
    %cst_22 = arith.constant 5.000000e-01 : f32
    %35 = vector.broadcast %cst_22 : f32 to vector<8x128xf32>
    %36 = arith.mulf %35, %34 : vector<8x128xf32>
    %cst_23 = arith.constant 5.000000e-01 : f32
    %37 = vector.broadcast %cst_23 : f32 to vector<8x128xf32>
    %38 = arith.addf %36, %37 : vector<8x128xf32>
    %39 = arith.truncf %38 : vector<8x128xf32> to vector<8x128xbf16>
    %c0_24 = arith.constant 0 : index
    %c0_25 = arith.constant 0 : index
    %40 = vector.load %arg8[%c0_24, %c0_25] : memref<128x128xbf16, #tpu.memory_space<vmem>>, vector<128x128xbf16>
    %cst_26 = arith.constant dense<0.000000e+00> : vector<8x128xf32>
    %41 = tpu.matmul %39, %40, %cst_26 {dimension_numbers = #tpu.dot_dimension_numbers<[1], [0], [0], [1], [0, 0, 1, 1], [], []>} : vector<8x128xbf16>, vector<128x128xbf16>, vector<8x128xf32> -> vector<8x128xf32>
    %c0_27 = arith.constant 0 : index
    %c0_28 = arith.constant 0 : index
    %42 = vector.load %arg9[%c0_27, %c0_28] : memref<1x128xf32, #tpu.memory_space<vmem>>, vector<1x128xf32>
    %43 = vector.broadcast %42 : vector<1x128xf32> to vector<8x128xf32>
    %44 = arith.addf %41, %43 : vector<8x128xf32>
    %cst_29 = arith.constant 5.000000e-01 : f32
    %45 = vector.broadcast %cst_29 : f32 to vector<8x128xf32>
    %46 = arith.mulf %45, %44 : vector<8x128xf32>
    %47 = math.tanh %46 : vector<8x128xf32>
    %cst_30 = arith.constant 5.000000e-01 : f32
    %48 = vector.broadcast %cst_30 : f32 to vector<8x128xf32>
    %49 = arith.mulf %48, %47 : vector<8x128xf32>
    %cst_31 = arith.constant 5.000000e-01 : f32
    %50 = vector.broadcast %cst_31 : f32 to vector<8x128xf32>
    %51 = arith.addf %49, %50 : vector<8x128xf32>
    %52 = arith.truncf %51 : vector<8x128xf32> to vector<8x128xbf16>
    %c0_32 = arith.constant 0 : index
    %c0_33 = arith.constant 0 : index
    %53 = vector.load %arg10[%c0_32, %c0_33] : memref<128x128xbf16, #tpu.memory_space<vmem>>, vector<128x128xbf16>
    %cst_34 = arith.constant dense<0.000000e+00> : vector<8x128xf32>
    %54 = tpu.matmul %52, %53, %cst_34 {dimension_numbers = #tpu.dot_dimension_numbers<[1], [0], [0], [1], [0, 0, 1, 1], [], []>} : vector<8x128xbf16>, vector<128x128xbf16>, vector<8x128xf32> -> vector<8x128xf32>
    %c0_35 = arith.constant 0 : index
    %c0_36 = arith.constant 0 : index
    %55 = vector.load %arg11[%c0_35, %c0_36] : memref<1x128xf32, #tpu.memory_space<vmem>>, vector<1x128xf32>
    %56 = vector.broadcast %55 : vector<1x128xf32> to vector<8x128xf32>
    %57 = arith.addf %54, %56 : vector<8x128xf32>
    %cst_37 = arith.constant dense<0xFF800000> : vector<8xf32>
    %58 = vector.multi_reduction <maximumf>, %57, %cst_37 [1] : vector<8x128xf32> to vector<8xf32>
    %59 = vector.shape_cast %58 : vector<8xf32> to vector<8x1xf32>
    %60 = vector.broadcast %59 : vector<8x1xf32> to vector<8x128xf32>
    %61 = arith.subf %57, %60 : vector<8x128xf32>
    %62 = math.exp %61 : vector<8x128xf32>
    %cst_38 = arith.constant dense<0.000000e+00> : vector<8xf32>
    %63 = vector.multi_reduction <add>, %62, %cst_38 [1] : vector<8x128xf32> to vector<8xf32>
    %64 = vector.shape_cast %63 : vector<8xf32> to vector<8x1xf32>
    %65 = tpu.reciprocal %64 {approx = true} : vector<8x1xf32> -> vector<8x1xf32>
    %66 = vector.broadcast %65 : vector<8x1xf32> to vector<8x128xf32>
    %67 = arith.mulf %62, %66 : vector<8x128xf32>
    %68 = arith.truncf %67 : vector<8x128xf32> to vector<8x128xbf16>
    %c0_39 = arith.constant 0 : index
    %c0_40 = arith.constant 0 : index
    %69 = vector.load %arg12[%c0_39, %c0_40] : memref<8x128xbf16, #tpu.memory_space<vmem>>, vector<8x128xbf16>
    tpu.vector_store %arg12[%c0_39, %c0_40], %68 {strides = array<i32>} : memref<8x128xbf16, #tpu.memory_space<vmem>>, vector<8x128xbf16>,
    return
  }
  func.func @transform_0(%arg0: i32) -> (i32, i32) {
    %c0_i32 = arith.constant 0 : i32
    %c0_i32_0 = arith.constant 0 : i32
    return %arg0, %c0_i32 : i32, i32
  }
  func.func @transform_1(%arg0: i32) -> (i32, i32) {
    %c0_i32 = arith.constant 0 : i32
    %c0_i32_0 = arith.constant 0 : i32
    %c0_i32_1 = arith.constant 0 : i32
    return %c0_i32, %c0_i32_0 : i32, i32
  }
  func.func @transform_2(%arg0: i32) -> (i32, i32) {
    %c0_i32 = arith.constant 0 : i32
    %c0_i32_0 = arith.constant 0 : i32
    %c0_i32_1 = arith.constant 0 : i32
    return %c0_i32, %c0_i32_0 : i32, i32
  }
  func.func @transform_3(%arg0: i32) -> (i32, i32) {
    %c0_i32 = arith.constant 0 : i32
    %c0_i32_0 = arith.constant 0 : i32
    %c0_i32_1 = arith.constant 0 : i32
    return %c0_i32, %c0_i32_0 : i32, i32
  }
  func.func @transform_4(%arg0: i32) -> (i32, i32) {
    %c0_i32 = arith.constant 0 : i32
    %c0_i32_0 = arith.constant 0 : i32
    %c0_i32_1 = arith.constant 0 : i32
    return %c0_i32, %c0_i32_0 : i32, i32
  }
  func.func @transform_5(%arg0: i32) -> (i32, i32) {
    %c0_i32 = arith.constant 0 : i32
    %c0_i32_0 = arith.constant 0 : i32
    %c0_i32_1 = arith.constant 0 : i32
    return %c0_i32, %c0_i32_0 : i32, i32
  }
  func.func @transform_6(%arg0: i32) -> (i32, i32) {
    %c0_i32 = arith.constant 0 : i32
    %c0_i32_0 = arith.constant 0 : i32
    %c0_i32_1 = arith.constant 0 : i32
    return %c0_i32, %c0_i32_0 : i32, i32
  }
  func.func @transform_7(%arg0: i32) -> (i32, i32) {
    %c0_i32 = arith.constant 0 : i32
    %c0_i32_0 = arith.constant 0 : i32
    %c0_i32_1 = arith.constant 0 : i32
    return %c0_i32, %c0_i32_0 : i32, i32
  }
  func.func @transform_8(%arg0: i32) -> (i32, i32) {
    %c0_i32 = arith.constant 0 : i32
    %c0_i32_0 = arith.constant 0 : i32
    %c0_i32_1 = arith.constant 0 : i32
    return %c0_i32, %c0_i32_0 : i32, i32
  }
  func.func @transform_9(%arg0: i32) -> (i32, i32) {
    %c0_i32 = arith.constant 0 : i32
    %c0_i32_0 = arith.constant 0 : i32
    %c0_i32_1 = arith.constant 0 : i32
    return %c0_i32, %c0_i32_0 : i32, i32
  }
  func.func @transform_10(%arg0: i32) -> (i32, i32) {
    %c0_i32 = arith.constant 0 : i32
    %c0_i32_0 = arith.constant 0 : i32
    %c0_i32_1 = arith.constant 0 : i32
    return %c0_i32, %c0_i32_0 : i32, i32
  }
  func.func @transform_11(%arg0: i32) -> (i32, i32) {
    %c0_i32 = arith.constant 0 : i32
    %c0_i32_0 = arith.constant 0 : i32
    return %arg0, %c0_i32 : i32, i32
  }
}

</mosaic_0001>

<bundles_post_ra>
// kernel: nn_forward.1
= control target key start
LH: loop header
LB: loop body
LE: loop exit
PB: predicated region body
PF: predicated region fallthrough
CT: control target
= control target key end

     0   :  { %vm667_vm0 = vcmask 130048   ;;  %vm1867_vm1 = vmmov 0   ;;  %s2414_s1 = inlined_call_operand.vmem [shape: bf16[784,256], index: 1, kind: input, shape index: {}]   ;;  %s2415_s0 = inlined_call_operand.vmem [shape: bf16[8,784], index: 0, kind: input, shape index: {}]   ;;  %s2416_s3 = inlined_call_operand.vmem [shape: bf16[256,128], index: 3, kind: input, shape index: {}]   ;;  %s2417_s5 = inlined_call_operand.vmem [shape: bf16[128,128], index: 5, kind: input, shape index: {}]   ;;  %s2418_s2 = inlined_call_operand.vmem [shape: f32[1,256], index: 2, kind: input, shape index: {}]   ;;  %s2419_s7 = inlined_call_operand.vmem [shape: bf16[128,128], index: 7, kind: input, shape index: {}]   ;;  %s2420_s4 = inlined_call_operand.vmem [shape: f32[1,128], index: 4, kind: input, shape index: {}]   ;;  %s2421_s9 = inlined_call_operand.vmem [shape: bf16[128,128], index: 9, kind: input, shape index: {}]   ;;  %s2422_s6 = inlined_call_operand.vmem [shape: f32[1,128], index: 6, kind: input, shape index: {}]   ;;  %s2423_s8 = inlined_call_operand.vmem [shape: f32[1,128], index: 8, kind: input, shape index: {}]   ;;  %s2424_s10 = inlined_call_operand.vmem [shape: f32[1,128], index: 10, kind: input, shape index: {}]   ;;  %s2425_s11 = inlined_call_operand.vmem [shape: bf16[8,128], index: 11, kind: output, shape index: {}]  }
   0x1   :  { %v1657_v0 = vld [vmem:[%s2414_s1 + $0x104] ss:$8 sps:$4 sm:$0xff]   ;;  %v1659_v1 = vld [vmem:[%s2414_s1 + $0x100] ss:$8 sps:$4 sm:$0xff]   ;;  %v1660_v2 = vld [vmem:[%s2414_s1 + $0x114] ss:$8 sps:$4 sm:$0xff]  }
   0x2   :  { %712 = vmatprep.subr.bf16.mxu0 %v1657_v0  ;;  %v1662_v3 = vld [vmem:[%s2414_s1 + $0x110] ss:$8 sps:$4 sm:$0xff]   ;;  %v1663_v4 = vld [vmem:[%s2414_s1 + $0x124] ss:$8 sps:$4 sm:$0xff]   ;;  %v1665_v5 = vld [vmem:[%s2414_s1 + $0x120] ss:$8 sps:$4 sm:$0xff]  }
   0x3   :  { %713 = vmatpush1.bf16.msra.mxu0 %v1659_v1  ;;  %v1666_v6 = vld [vmem:[%s2414_s1 + $0x134] ss:$8 sps:$4 sm:$0xff]   ;;  %v1668_v7 = vld [vmem:[%s2414_s1 + $0x130] ss:$8 sps:$4 sm:$0xff]   ;;  %v1669_v8 = vld [vmem:[%s2414_s1 + $0x144] ss:$8 sps:$4 sm:$0xff]  }
   0x4   :  { %714 = vmatprep.subr.bf16.mxu0 %v1660_v2  ;;  %v1671_v9 = vld [vmem:[%s2414_s1 + $0x140] ss:$8 sps:$4 sm:$0xff]   ;;  %v1672_v10 = vld [vmem:[%s2414_s1 + $0x154] ss:$8 sps:$4 sm:$0xff]   ;;  %v1674_v11 = vld [vmem:[%s2414_s1 + $0x150] ss:$8 sps:$4 sm:$0xff]  }
   0x5   :  { %v1675_v12 = vld [vmem:[%s2414_s1 + $0x164] ss:$8 sps:$4 sm:$0xff]   ;;  %v1677_v15 = vld [vmem:[%s2414_s1 + $0x160] ss:$8 sps:$4 sm:$0xff]   ;;  %v1678_v16 = vld [vmem:[%s2414_s1 + $0x174] ss:$8 sps:$4 sm:$0xff]  }
   0x6   :  { %v1970_v13 = vld [vmem:[%s2415_s0 + $0x8] sm:$0xff]  ;;  %v1680_v18 = vld [vmem:[%s2414_s1 + $0x170] ss:$8 sps:$4 sm:$0xff]   ;;  %v1720_v21 = vld [vmem:[%s2414_s1 + $0x14] ss:$8 sps:$4 sm:$0xff]  }
   0x7   :  { %715 = vmatpush1.bf16.msra.mxu0 %v1662_v3  ;;  %v1386_v14 = vcombine.high %v1970_v13, %v1970_v13  ;;  %v1714_v17 = vld [vmem:[%s2414_s1 + $0x4] ss:$8 sps:$4 sm:$0xff]   ;;  %v1719_v20 = vld [vmem:[%s2414_s1] ss:$8 sps:$4 sm:$0xff]   ;;  %v1725_v23 = vld [vmem:[%s2414_s1 + $0x10] ss:$8 sps:$4 sm:$0xff]   ;;  %v1385_v55 = vcombine.low %v1970_v13, %v1970_v13 }
   0x8   :  { %716 = vmatprep.subr.bf16.mxu0 %v1663_v4  ;;  %v1681_v19 = vld [vmem:[%s2414_s1 + $0x184] ss:$8 sps:$4 sm:$0xff]   ;;  %671 = vmatprep.subr.bf16.mxu1 %v1714_v17  ;;  %v1683_v22 = vld [vmem:[%s2414_s1 + $0x180] ss:$8 sps:$4 sm:$0xff]   ;;  %v1684_v25 = vld [vmem:[%s2414_s1 + $0x194] ss:$8 sps:$4 sm:$0xff]  }
   0x9   :  { %744 = vmatprep.mubr.bf16.mxu0 %v1386_v14  ;;  %672 = vmatpush1.bf16.msra.mxu1 %v1719_v20  ;;  %v1726_v24 = vld [vmem:[%s2414_s1 + $0x24] ss:$8 sps:$4 sm:$0xff]   ;;  %v1731_v26 = vld [vmem:[%s2414_s1 + $0x20] ss:$8 sps:$4 sm:$0xff]   ;;  %v1732_v27 = vld [vmem:[%s2414_s1 + $0x34] ss:$8 sps:$4 sm:$0xff]  }
   0xa   :  { %673 = vmatprep.subr.bf16.mxu1 %v1720_v21  ;;  %v1686_v28 = vld [vmem:[%s2414_s1 + $0x190] ss:$8 sps:$4 sm:$0xff]   ;;  %v1687_v29 = vld [vmem:[%s2414_s1 + $0x1a4] ss:$8 sps:$4 sm:$0xff]   ;;  %v1689_v32 = vld [vmem:[%s2414_s1 + $0x1a0] ss:$8 sps:$4 sm:$0xff]  }
   0xb   :  { %717 = vmatpush1.bf16.msra.mxu0 %v1665_v5  ;;  %v1737_v30 = vld [vmem:[%s2414_s1 + $0x30] ss:$8 sps:$4 sm:$0xff]   ;;  %v1738_v31 = vld [vmem:[%s2414_s1 + $0x44] ss:$8 sps:$4 sm:$0xff]   ;;  %v1690_v33 = vld [vmem:[%s2414_s1 + $0x1b4] ss:$8 sps:$4 sm:$0xff]  }
   0xc   :  { %718 = vmatprep.subr.bf16.mxu0 %v1666_v6  ;;  %v1743_v34 = vld [vmem:[%s2414_s1 + $0x40] ss:$8 sps:$4 sm:$0xff]   ;;  %v1744_v35 = vld [vmem:[%s2414_s1 + $0x54] ss:$8 sps:$4 sm:$0xff]   ;;  %v1692_v36 = vld [vmem:[%s2414_s1 + $0x1b0] ss:$8 sps:$4 sm:$0xff]  }
   0xd   :  { %674 = vmatpush1.bf16.msra.mxu1 %v1725_v23  ;;  %v1693_v37 = vld [vmem:[%s2414_s1 + $0x1c4] ss:$8 sps:$4 sm:$0xff]   ;;  %v1749_v38 = vld [vmem:[%s2414_s1 + $0x50] ss:$8 sps:$4 sm:$0xff]   ;;  %v1695_v40 = vld [vmem:[%s2414_s1 + $0x1c0] ss:$8 sps:$4 sm:$0xff]  }
   0xe   :  { %675 = vmatprep.subr.bf16.mxu1 %v1726_v24  ;;  %v1750_v39 = vld [vmem:[%s2414_s1 + $0x64] ss:$8 sps:$4 sm:$0xff]   ;;  %v1696_v41 = vld [vmem:[%s2414_s1 + $0x1d4] ss:$8 sps:$4 sm:$0xff]   ;;  %v1755_v42 = vld [vmem:[%s2414_s1 + $0x60] ss:$8 sps:$4 sm:$0xff]  }
   0xf   :  { %719 = vmatpush1.bf16.msra.mxu0 %v1668_v7  ;;  %v1756_v43 = vld [vmem:[%s2414_s1 + $0x74] ss:$8 sps:$4 sm:$0xff]   ;;  %v1698_v44 = vld [vmem:[%s2414_s1 + $0x1d0] ss:$8 sps:$4 sm:$0xff]   ;;  %v1699_v45 = vld [vmem:[%s2414_s1 + $0x1e4] ss:$8 sps:$4 sm:$0xff]  }
  0x10   :  { %720 = vmatprep.subr.bf16.mxu0 %v1669_v8  ;;  %v1761_v46 = vld [vmem:[%s2414_s1 + $0x70] ss:$8 sps:$4 sm:$0xff]   ;;  %v1762_v47 = vld [vmem:[%s2414_s1 + $0x84] ss:$8 sps:$4 sm:$0xff]   ;;  %v1701_v48 = vld [vmem:[%s2414_s1 + $0x1e0] ss:$8 sps:$4 sm:$0xff]  }
  0x11   :  { %676 = vmatpush1.bf16.msra.mxu1 %v1731_v26  ;;  %v1702_v49 = vld [vmem:[%s2414_s1 + $0x1f4] ss:$8 sps:$4 sm:$0xff]   ;;  %v1767_v50 = vld [vmem:[%s2414_s1 + $0x80] ss:$8 sps:$4 sm:$0xff]   ;;  %v1704_v52 = vld [vmem:[%s2414_s1 + $0x1f0] ss:$8 sps:$4 sm:$0xff]  }
  0x12   :  { %677 = vmatprep.subr.bf16.mxu1 %v1732_v27  ;;  %v1768_v51 = vld [vmem:[%s2414_s1 + $0x94] ss:$8 sps:$4 sm:$0xff]   ;;  %v1710_v53 = vld [vmem:[%s2414_s1 + $0x204] ss:$8 sps:$4 sm:$0xff]   ;;  %v1773_v54 = vld [vmem:[%s2414_s1 + $0x90] ss:$8 sps:$4 sm:$0xff]  }
  0x13   :  { %721 = vmatpush1.bf16.msra.mxu0 %v1671_v9  ;;  %v1774_v56 = vld [vmem:[%s2414_s1 + $0xa4] ss:$8 sps:$4 sm:$0xff]   ;;  %v2102_v57 = vld [vmem:[%s2415_s0 + $0x10] sm:$0xff]  ;;  %v1708_v58 = vld [vmem:[%s2414_s1 + $0x200] ss:$8 sps:$4 sm:$0xff]  }
  0x14   :  { %722 = vmatprep.subr.bf16.mxu0 %v1672_v10  ;;  %v1388_v59 = vcombine.high %v2102_v57, %v2102_v57  ;;  %v1713_v60 = vld [vmem:[%s2414_s1 + $0x214] ss:$8 sps:$4 sm:$0xff]   ;;  %v1779_v61 = vld [vmem:[%s2414_s1 + $0xa0] ss:$8 sps:$4 sm:$0xff]   ;;  %v1711_v62 = vld [vmem:[%s2414_s1 + $0x210] ss:$8 sps:$4 sm:$0xff]  }
  0x15   :  { %678 = vmatpush1.bf16.msra.mxu1 %v1737_v30  ;;  %v1780_v63 = vld [vmem:[%s2414_s1 + $0xb4] ss:$8 sps:$4 sm:$0xff]   ;;  %v39_v0 = vld [vmem:[%s2415_s0] sm:$0xff]  ;;  %v1785_v3 = vld [vmem:[%s2414_s1 + $0xb0] ss:$8 sps:$4 sm:$0xff]  }
  0x16   :  { %679 = vmatprep.subr.bf16.mxu1 %v1738_v31  ;;  %v1718_v1 = vld [vmem:[%s2414_s1 + $0x224] ss:$8 sps:$4 sm:$0xff]   ;;  %v1384_v2 = vcombine.high %v39_v0, %v39_v0  ;;  %v1716_v4 = vld [vmem:[%s2414_s1 + $0x220] ss:$8 sps:$4 sm:$0xff]   ;;  %v1724_v6 = vld [vmem:[%s2414_s1 + $0x234] ss:$8 sps:$4 sm:$0xff]  }
  0x17   :  { %723 = vmatpush1.bf16.msra.mxu0 %v1674_v11  ;;  %v1786_v5 = vld [vmem:[%s2414_s1 + $0xc4] ss:$8 sps:$4 sm:$0xff]   ;;  %v1791_v7 = vld [vmem:[%s2414_s1 + $0xc0] ss:$8 sps:$4 sm:$0xff]   ;;  %v1792_v8 = vld [vmem:[%s2414_s1 + $0xd4] ss:$8 sps:$4 sm:$0xff]  }
  0x18   :  { %724 = vmatprep.subr.bf16.mxu0 %v1675_v12  ;;  %703 = vmatprep.mubr.bf16.mxu1 %v1384_v2  ;;  %v1722_v9 = vld [vmem:[%s2414_s1 + $0x230] ss:$8 sps:$4 sm:$0xff]   ;;  %v1730_v10 = vld [vmem:[%s2414_s1 + $0x244] ss:$8 sps:$4 sm:$0xff]   ;;  %v1728_v13 = vld [vmem:[%s2414_s1 + $0x240] ss:$8 sps:$4 sm:$0xff]  }
  0x19   :  { %680 = vmatpush1.bf16.msra.mxu1 %v1743_v34  ;;  %v1797_v11 = vld [vmem:[%s2414_s1 + $0xd0] ss:$8 sps:$4 sm:$0xff]   ;;  %v1800_v12 = vld [vmem:[%s2414_s1 + $0xe4] ss:$8 sps:$4 sm:$0xff]   ;;  %v1736_v14 = vld [vmem:[%s2414_s1 + $0x254] ss:$8 sps:$4 sm:$0xff]  }
  0x1a   :  { %681 = vmatprep.subr.bf16.mxu1 %v1744_v35  ;;  %v1734_v17 = vld [vmem:[%s2414_s1 + $0x250] ss:$8 sps:$4 sm:$0xff]   ;;  %v1740_v20 = vld [vmem:[%s2414_s1 + $0x260] ss:$8 sps:$4 sm:$0xff]   ;;  %v1748_v21 = vld [vmem:[%s2414_s1 + $0x274] ss:$8 sps:$4 sm:$0xff]  }
  0x1b   :  { %725 = vmatpush1.bf16.msra.mxu0 %v1677_v15  ;;  %v1805_v15 = vld [vmem:[%s2414_s1 + $0xe0] ss:$8 sps:$4 sm:$0xff]   ;;  %v1746_v23 = vld [vmem:[%s2414_s1 + $0x270] ss:$8 sps:$4 sm:$0xff]   ;;  %v1754_v24 = vld [vmem:[%s2414_s1 + $0x284] ss:$8 sps:$4 sm:$0xff]  }
  0x1c   :  { %726 = vmatprep.subr.bf16.mxu0 %v1678_v16  ;;  %v1806_v16 = vld [vmem:[%s2414_s1 + $0xf4] ss:$8 sps:$4 sm:$0xff]   ;;  %v1758_v27 = vld [vmem:[%s2414_s1 + $0x290] ss:$8 sps:$4 sm:$0xff]  }
  0x1d   :  { %682 = vmatpush1.bf16.msra.mxu1 %v1749_v38  ;;  %v1760_v26 = vld [vmem:[%s2414_s1 + $0x294] ss:$8 sps:$4 sm:$0xff]   ;;  %v1770_v31 = vld [vmem:[%s2414_s1 + $0x2b0] ss:$8 sps:$4 sm:$0xff]  }
  0x1e   :  { %683 = vmatprep.subr.bf16.mxu1 %v1750_v39  ;;  %v1772_v30 = vld [vmem:[%s2414_s1 + $0x2b4] ss:$8 sps:$4 sm:$0xff]   ;;  %v1782_v35 = vld [vmem:[%s2414_s1 + $0x2d0] ss:$8 sps:$4 sm:$0xff]  }
  0x1f   :  { %727 = vmatpush1.bf16.msra.mxu0 %v1680_v18  ;;  %v1742_v18 = vld [vmem:[%s2414_s1 + $0x264] ss:$8 sps:$4 sm:$0xff]   ;;  %v1784_v34 = vld [vmem:[%s2414_s1 + $0x2d4] ss:$8 sps:$4 sm:$0xff]   ;;  %v1794_v39 = vld [vmem:[%s2414_s1 + $0x2f0] ss:$8 sps:$4 sm:$0xff]  }
  0x20   :  { %728 = vmatprep.subr.bf16.mxu0 %v1681_v19  ;;  %v1808_v19 = vld [vmem:[%s2414_s1 + $0xf0] ss:$8 sps:$4 sm:$0xff]   ;;  %v1796_v38 = vld [vmem:[%s2414_s1 + $0x2f4] ss:$8 sps:$4 sm:$0xff]  }
  0x21   :  { %684 = vmatpush1.bf16.msra.mxu1 %v1755_v42  ;;  %v1802_v42 = vld [vmem:[%s2414_s1 + $0x300] ss:$8 sps:$4 sm:$0xff]  }
  0x22   :  { %685 = vmatprep.subr.bf16.mxu1 %v1756_v43  ;;  %v1811_v43 = vld [vmem:[%s2416_s3 + $0x40] sm:$0xff]  }
  0x23   :  { %729 = vmatpush1.bf16.msra.mxu0 %v1683_v22  ;;  %v1383_v22 = vcombine.low %v39_v0, %v39_v0 }
  0x24   :  { %730 = vmatprep.subr.bf16.mxu0 %v1684_v25  ;;  %v1752_v25 = vld [vmem:[%s2414_s1 + $0x280] ss:$8 sps:$4 sm:$0xff]  }
  0x25   :  { %686 = vmatpush1.bf16.msra.mxu1 %v1761_v46  ;;  %v1812_v46 = vld [vmem:[%s2416_s3] sm:$0xff]  }
  0x26   :  { %687 = vmatprep.subr.bf16.mxu1 %v1762_v47  ;;  %v1813_v47 = vld [vmem:[%s2416_s3 + $0x48] sm:$0xff]  }
  0x27   :  { %731 = vmatpush1.bf16.msra.mxu0 %v1686_v28  ;;  %v1766_v28 = vld [vmem:[%s2414_s1 + $0x2a4] ss:$8 sps:$4 sm:$0xff]  }
  0x28   :  { %732 = vmatprep.subr.bf16.mxu0 %v1687_v29  ;;  %v1764_v29 = vld [vmem:[%s2414_s1 + $0x2a0] ss:$8 sps:$4 sm:$0xff]  }
  0x29   :  { %688 = vmatpush1.bf16.msra.mxu1 %v1767_v50  ;;  %v1816_v50 = vld [vmem:[%s2416_s3 + $0x10] sm:$0xff]  }
  0x2a   :  { %689 = vmatprep.subr.bf16.mxu1 %v1768_v51  ;;  %v1817_v51 = vld [vmem:[%s2416_s3 + $0x58] sm:$0xff]  }
  0x2b   :  { %733 = vmatpush1.bf16.msra.mxu0 %v1689_v32  ;;  %v1778_v32 = vld [vmem:[%s2414_s1 + $0x2c4] ss:$8 sps:$4 sm:$0xff]  }
  0x2c   :  { %734 = vmatprep.subr.bf16.mxu0 %v1690_v33  ;;  %v1776_v33 = vld [vmem:[%s2414_s1 + $0x2c0] ss:$8 sps:$4 sm:$0xff]  }
  0x2d   :  { %690 = vmatpush1.bf16.msra.mxu1 %v1773_v54  ;;  %v1820_v54 = vld [vmem:[%s2416_s3 + $0x20] sm:$0xff]  }
  0x2e   :  { %691 = vmatprep.subr.bf16.mxu1 %v1774_v56  ;;  %v1822_v56 = vld [vmem:[%s2416_s3 + $0x28] sm:$0xff]  }
  0x2f   :  { %735 = vmatpush1.bf16.msra.mxu0 %v1692_v36  ;;  %v1790_v36 = vld [vmem:[%s2414_s1 + $0x2e4] ss:$8 sps:$4 sm:$0xff]  }
  0x30   :  { %736 = vmatprep.subr.bf16.mxu0 %v1693_v37  ;;  %v1788_v37 = vld [vmem:[%s2414_s1 + $0x2e0] ss:$8 sps:$4 sm:$0xff]  }
  0x31   :  { %692 = vmatpush1.bf16.msra.mxu1 %v1779_v61  ;;  %v1866_v61 = vmov 0.0  }
  0x32   :  { %693 = vmatprep.subr.bf16.mxu1 %v1780_v63  ;;  %v1828_v63 = vld [vmem:[%s2417_s5 + $0x8] sm:$0xff]  }
  0x33   :  { %737 = vmatpush1.bf16.msra.mxu0 %v1695_v40  ;;  %v1804_v40 = vld [vmem:[%s2414_s1 + $0x304] ss:$8 sps:$4 sm:$0xff]  }
  0x34   :  { %738 = vmatprep.subr.bf16.mxu0 %v1696_v41  ;;  %v1387_v41 = vcombine.low %v2102_v57, %v2102_v57  ;;  %v1823_v57 = vld [vmem:[%s2416_s3 + $0x70] sm:$0xff]  }
  0x35   :  { %694 = vmatpush1.bf16.msra.mxu1 %v1785_v3 }
  0x36   :  { %695 = vmatprep.subr.bf16.mxu1 %v1786_v5 }
  0x37   :  { %739 = vmatpush1.bf16.msra.mxu0 %v1698_v44  ;;  %v1865_v44 = vmov 0  }
  0x38   :  { %740 = vmatprep.subr.bf16.mxu0 %v1699_v45  ;;  %v1707_v45 = vld [vmem:[%s2415_s0 + $0x18] ss:$0 sps:$4 sm:$0xff]  }
  0x39   :  { %696 = vmatpush1.bf16.msra.mxu1 %v1791_v7  ;;  %v141_v7 = vld [vmem:[%s2418_s2] sm:$0x3] }
  0x3a   :  { %697 = vmatprep.subr.bf16.mxu1 %v1792_v8 }
  0x3b   :  { %741 = vmatpush1.bf16.msra.mxu0 %v1701_v48  ;;  %v1814_v48 = vld [vmem:[%s2416_s3 + $0x8] sm:$0xff]  }
  0x3c   :  { %742 = vmatprep.subr.bf16.mxu0 %v1702_v49  ;;  %v1815_v49 = vld [vmem:[%s2416_s3 + $0x50] sm:$0xff]  }
  0x3d   :  { %698 = vmatpush1.bf16.msra.mxu1 %v1797_v11 }
  0x3e   :  { %699 = vmatprep.subr.bf16.mxu1 %v1800_v12 }
  0x3f   :  { %743 = vmatpush1.bf16.msra.mxu0 %v1704_v52  ;;  %v1818_v52 = vld [vmem:[%s2416_s3 + $0x18] sm:$0xff]  }
  0x40   :  { %753 = vmatprep.subr.bf16.mxu0 %v1710_v53  ;;  %v1819_v53 = vld [vmem:[%s2416_s3 + $0x60] sm:$0xff]  }
  0x41   :  { %700 = vmatpush1.bf16.msra.mxu1 %v1805_v15 }
  0x42   :  { %745 = vmatmul.mubr.bf16.vlgmr.msra.gmra.mrb[0].mxu0 %v1385_v55  ;;  %701 = vmatprep.subr.bf16.mxu1 %v1806_v16  ;;  %v1821_v55 = vld [vmem:[%s2416_s3 + $0x68] sm:$0xff]  }
  0x43   :  { %754 = vmatpush1.bf16.msra.mxu0 %v1708_v58  ;;  %785 = vmatprep.mubr.bf16.mxu0 %v1388_v59  ;;  %v1824_v58 = vld [vmem:[%s2416_s3 + $0x30] sm:$0xff]   ;;  %v1825_v59 = vld [vmem:[%s2416_s3 + $0x78] sm:$0xff]  }
  0x44   :  { %755 = vmatprep.subr.bf16.mxu0 %v1713_v60  ;;  %v1826_v60 = vld [vmem:[%s2416_s3 + $0x38] sm:$0xff]  }
  0x45   :  { %702 = vmatpush1.bf16.msra.mxu1 %v1808_v19 }
  0x46   :  { %1582 = vmatprep.subr.bf16.mxu1 %v1866_v61 }
  0x47   :  { %756 = vmatpush1.bf16.msra.mxu0 %v1711_v62  ;;  %v1827_v62 = vld [vmem:[%s2417_s5] sm:$0xff]  }
  0x48   :  { %757 = vmatprep.subr.bf16.mxu0 %v1718_v1  ;;  %704 = vmatmul.mubr.bf16.vlgmr.msra.gmra.mrb[0].mxu1 %v1383_v22 }
  0x49   :  { %1583 = vmatpush3.bf16.msra.mxu1 %v1827_v62  ;;  %1598 = vmatprep.mubr.msk.bf16.mxu1 %vm1867_vm1, %v1866_v61 }
  0x4a   :  { %1584 = vmatprep.subr.bf16.mxu1 %v1866_v61 }
  0x4b   :  { %758 = vmatpush1.bf16.msra.mxu0 %v1716_v4  ;;  %v143_v4 = vlaneseq }
  0x4c   :  { %759 = vmatprep.subr.bf16.mxu0 %v1724_v6 }
  0x4d   :  { %1585 = vmatpush3.bf16.msra.mxu1 %v1828_v63  ;;  %v144_v5 = vshrl.u32 %v143_v4, 7  ;;  %v1844_v4 = vld [vmem:[%s2421_s9 + $0x8] sm:$0xff]  }
  0x4e   :  { %1586 = vmatprep.subr.bf16.mxu1 %v1866_v61 }
  0x4f   :  { %760 = vmatpush1.bf16.msra.mxu0 %v1722_v9  ;;  %v145_v6 = vsub.s32 0, %v144_v5  ;;  %v149_v8 = vsub.s32 1, %v144_v5  ;;  %v1845_v5 = vld [vmem:[%s2421_s9 + $0x10] sm:$0xff]  }
  0x50   :  { %761 = vmatprep.subr.bf16.mxu0 %v1730_v10 }
  0x51   :  { %v146_v9 = vrot.slane %v141_v7, %v145_v6  ;;  %v150_v10 = vrot.slane %v141_v7, %v149_v8  ;;  %v1846_v6 = vld [vmem:[%s2421_s9 + $0x18] sm:$0xff]   ;;  %v1847_v7 = vld [vmem:[%s2421_s9 + $0x20] sm:$0xff]   ;;  %v1848_v8 = vld [vmem:[%s2421_s9 + $0x28] sm:$0xff]  }
  0x53   :  { %762 = vmatpush1.bf16.msra.mxu0 %v1728_v13 }
  0x54   :  { %763 = vmatprep.subr.bf16.mxu0 %v1736_v14 }
  0x57   :  { %764 = vmatpush1.bf16.msra.mxu0 %v1734_v17 }
  0x58   :  { %765 = vmatprep.subr.bf16.mxu0 %v1742_v18 }
  0x5b   :  { %766 = vmatpush1.bf16.msra.mxu0 %v1740_v20 }
  0x5c   :  { %767 = vmatprep.subr.bf16.mxu0 %v1748_v21 }
  0x5f   :  { %768 = vmatpush1.bf16.msra.mxu0 %v1746_v23 }
  0x60   :  { %769 = vmatprep.subr.bf16.mxu0 %v1754_v24 }
  0x63   :  { %770 = vmatpush1.bf16.msra.mxu0 %v1752_v25 }
  0x64   :  { %771 = vmatprep.subr.bf16.mxu0 %v1760_v26 }
  0x67   :  { %772 = vmatpush1.bf16.msra.mxu0 %v1758_v27 }
  0x68   :  { %773 = vmatprep.subr.bf16.mxu0 %v1766_v28 }
  0x6b   :  { %774 = vmatpush1.bf16.msra.mxu0 %v1764_v29  ;;  %v1829_v29 = vld [vmem:[%s2417_s5 + $0x10] sm:$0xff]  }
  0x6c   :  { %775 = vmatprep.subr.bf16.mxu0 %v1772_v30  ;;  %1587 = vmatpush3.bf16.msra.mxu1 %v1829_v29  ;;  %v1830_v30 = vld [vmem:[%s2417_s5 + $0x18] sm:$0xff]  }
  0x6d   :  { %1588 = vmatprep.subr.bf16.mxu1 %v1866_v61 }
  0x6f   :  { %776 = vmatpush1.bf16.msra.mxu0 %v1770_v31  ;;  %v1831_v31 = vld [vmem:[%s2417_s5 + $0x20] sm:$0xff]  }
  0x70   :  { %777 = vmatprep.subr.bf16.mxu0 %v1778_v32  ;;  %1589 = vmatpush3.bf16.msra.mxu1 %v1830_v30  ;;  %v1832_v32 = vld [vmem:[%s2417_s5 + $0x28] sm:$0xff]  }
  0x71   :  { %1590 = vmatprep.subr.bf16.mxu1 %v1866_v61 }
  0x73   :  { %778 = vmatpush1.bf16.msra.mxu0 %v1776_v33  ;;  %v1833_v33 = vld [vmem:[%s2417_s5 + $0x30] sm:$0xff]  }
  0x74   :  { %779 = vmatprep.subr.bf16.mxu0 %v1784_v34  ;;  %1591 = vmatpush3.bf16.msra.mxu1 %v1831_v31  ;;  %v1834_v34 = vld [vmem:[%s2417_s5 + $0x38] sm:$0xff]  }
  0x75   :  { %1592 = vmatprep.subr.bf16.mxu1 %v1866_v61 }
  0x77   :  { %780 = vmatpush1.bf16.msra.mxu0 %v1782_v35 }
  0x78   :  { %781 = vmatprep.subr.bf16.mxu0 %v1790_v36  ;;  %1593 = vmatpush3.bf16.msra.mxu1 %v1832_v32  ;;  %v1489_v36 = vld [vmem:[%s2420_s4] ss:$0 sm:$0xff] }
  0x79   :  { %1594 = vmatprep.subr.bf16.mxu1 %v1866_v61 }
  0x7b   :  { %782 = vmatpush1.bf16.msra.mxu0 %v1788_v37 }
  0x7c   :  { %783 = vmatprep.subr.bf16.mxu0 %v1796_v38  ;;  %1595 = vmatpush3.bf16.msra.mxu1 %v1833_v33 }
  0x7d   :  { %1596 = vmatprep.subr.bf16.mxu1 %v1866_v61 }
  0x7f   :  { %784 = vmatpush1.bf16.msra.mxu0 %v1794_v39 }
  0x80   :  { %794 = vmatprep.subr.bf16.mxu0 %v1804_v40  ;;  %1597 = vmatpush3.bf16.msra.mxu1 %v1834_v34 }
  0x81   :  { %1602 = vmatprep.subr.bf16.mxu1 %v1866_v61 }
  0x82   :  { %786 = vmatmul.mubr.bf16.vlgmr.msra.gmra.mrb[0].mxu0 %v1387_v41 }
  0x83   :  { %795 = vmatpush1.bf16.msra.mxu0 %v1802_v42  ;;  %826 = vmatprep.mubr.bf16.mxu0 %v1865_v44 }
  0x84   :  { %1533 = vmatprep.subr.bf16.mxu0 %v1811_v43 }
  0x8e   :  { %1488 = vmatmul.mubr.msk.bf16.vlgmr.msra.gmra.mrb[0].mxu0 %vm667_vm0, %v1707_v45 }
  0x8f   :  { %1534 = vmatpush3.bf16.msra.mxu0 %v1812_v46  ;;  %v1835_v46 = vld [vmem:[%s2419_s7] sm:$0xff]  }
  0x90   :  { %1535 = vmatprep.subr.bf16.mxu0 %v1813_v47 }
  0x93   :  { %1536 = vmatpush3.bf16.msra.mxu0 %v1814_v48  ;;  %v1836_v48 = vld [vmem:[%s2419_s7 + $0x8] sm:$0xff]  }
  0x94   :  { %1537 = vmatprep.subr.bf16.mxu0 %v1815_v49  ;;  %v1837_v49 = vld [vmem:[%s2419_s7 + $0x10] sm:$0xff]  }
  0x97   :  { %1538 = vmatpush3.bf16.msra.mxu0 %v1816_v50  ;;  %v1838_v50 = vld [vmem:[%s2419_s7 + $0x18] sm:$0xff]  }
  0x98   :  { %1539 = vmatprep.subr.bf16.mxu0 %v1817_v51  ;;  %v1839_v51 = vld [vmem:[%s2419_s7 + $0x20] sm:$0xff]  }
  0x9b   :  { %1540 = vmatpush3.bf16.msra.mxu0 %v1818_v52  ;;  %v1840_v52 = vld [vmem:[%s2419_s7 + $0x28] sm:$0xff]  }
  0x9c   :  { %1541 = vmatprep.subr.bf16.mxu0 %v1819_v53  ;;  %v1841_v53 = vld [vmem:[%s2419_s7 + $0x30] sm:$0xff]  }
  0x9f   :  { %1542 = vmatpush3.bf16.msra.mxu0 %v1820_v54  ;;  %v1842_v54 = vld [vmem:[%s2419_s7 + $0x38] sm:$0xff]  }
  0xa0   :  { %1543 = vmatprep.subr.bf16.mxu0 %v1821_v55  ;;  %v1506_v55 = vld [vmem:[%s2422_s6] ss:$0 sm:$0xff] }
  0xa3   :  { %1544 = vmatpush3.bf16.msra.mxu0 %v1822_v56 }
  0xa4   :  { %1545 = vmatprep.subr.bf16.mxu0 %v1823_v57 }
  0xa7   :  { %1546 = vmatpush3.bf16.msra.mxu0 %v1824_v58 }
  0xa8   :  { %1547 = vmatprep.subr.bf16.mxu0 %v1825_v59 }
  0xab   :  { %1548 = vmatpush3.bf16.msra.mxu0 %v1826_v60 }
 0x11b   :  { %v705_v0 = vpop.f32.mrb[0].mxu1 }
 0x11c   :  { %v707_v1 = vpop.f32.mrb[1].mxu1  ;;  %v706_v11 = vadd.f32 %v705_v0, %v146_v9  ;;  %v1849_v9 = vld [vmem:[%s2421_s9 + $0x30] sm:$0xff]  }
 0x11d   :  { %v709_v2 = vpop.f32.mrb[2].mxu1  ;;  %v708_v12 = vadd.f32 %v707_v1, %v150_v10  ;;  %v1850_v10 = vld [vmem:[%s2421_s9 + $0x38] sm:$0xff]  }
 0x11e   :  { %v710_v3 = vpop.f32.mrb[3].mxu1  ;;  %v1843_v2 = vld [vmem:[%s2421_s9] sm:$0xff]  }
 0x161   :  { %v828_v13 = vpop.f32.mrb[0].mxu0 }
 0x162   :  { %v1643_v14 = vadd.f32 %v828_v13, %v706_v11  ;;  %v830_v15 = vpop.f32.mrb[1].mxu0  ;;  %v1515_v11 = vld [vmem:[%s2423_s8] ss:$0 sm:$0xff] }
 0x163   :  { %v1645_v16 = vadd.f32 %v830_v15, %v708_v12  ;;  %v832_v17 = vpop.f32.mrb[2].mxu0 }
 0x164   :  { %v835_v18 = vmul.f32 0.5, %v1643_v14  ;;  %v833_v19 = vpop.f32.mrb[3].mxu0 }
 0x165   :  { %v836_v20 = vmul.f32 0.5, %v1645_v16 }
 0x166   :  { %1851 = vtanh.f32 %v835_v18 }
 0x167   :  { %1853 = vtanh.f32 %v836_v20 }
 0x170   :  { %v1852_v21 = vpop.eup %1851 }
 0x171   :  { %v1854_v22 = vpop.eup %1853  ;;  %v839_v23 = vmul.f32 0.5, %v1852_v21  ;;  %v1524_v21 = vld [vmem:[%s2424_s10] ss:$0 sm:$0xff] }
 0x172   :  { %v840_v24 = vmul.f32 0.5, %v1854_v22 }
 0x173   :  { %v841_v25 = vadd.f32 0.5, %v839_v23 }
 0x174   :  { %v842_v26 = vadd.f32 0.5, %v840_v24 }
 0x175   :  { %v843_v28 = vpack.c.bf16 %v841_v25, %v841_v25 }
 0x176   :  { %v844_v27 = vpack.c.bf16 %v842_v26, %v842_v26 }
 0x178   :  { %1012 = vmatprep.mubr.bf16.mxu0 %v844_v27 }
 0x179   :  { %1013 = vmatmul.mubr.bf16.vlgmr.msra.gmra.mrb[4].mxu0 %v843_v28 }
 0x24c   :  { %v1549_v35 = vpop.f32.mrb[4].mxu0 }
 0x24d   :  { %v1550_v37 = vpop.f32.mrb[5].mxu0 }
 0x24e   :  { %v1551_v38 = vadd.f32 %v1550_v37, %v1549_v35  ;;  %v1552_v39 = vpop.f32.mrb[6].mxu0 }
 0x24f   :  { %v1553_v40 = vpop.f32.mrb[7].mxu0 }
 0x250   :  { %v1015_v41 = vadd.f32 %v1551_v38, %v1489_v36 }
 0x252   :  { %v1020_v42 = vmul.f32 0.5, %v1015_v41 }
 0x254   :  { %1855 = vtanh.f32 %v1020_v42 }
 0x25e   :  { %v1856_v43 = vpop.eup %1855 }
 0x25f   :  { %v1022_v44 = vmul.f32 0.5, %v1856_v43 }
 0x261   :  { %v1023_v45 = vadd.f32 0.5, %v1022_v44 }
 0x263   :  { %v1024_v47 = vpack.c.bf16 %v1023_v45, %v1023_v45 }
 0x265   :  { %1599 = vmatmul.mubr.bf16.vlgmr.msra.gmra.mrb[4].mxu1 %v1024_v47 }
 0x266   :  { %1603 = vmatpush3.bf16.msra.mxu1 %v1835_v46  ;;  %1618 = vmatprep.mubr.msk.bf16.mxu1 %vm1867_vm1, %v1866_v61 }
 0x267   :  { %1604 = vmatprep.subr.bf16.mxu1 %v1866_v61 }
 0x26a   :  { %1605 = vmatpush3.bf16.msra.mxu1 %v1836_v48 }
 0x26b   :  { %1606 = vmatprep.subr.bf16.mxu1 %v1866_v61 }
 0x26e   :  { %1607 = vmatpush3.bf16.msra.mxu1 %v1837_v49 }
 0x26f   :  { %1608 = vmatprep.subr.bf16.mxu1 %v1866_v61 }
 0x272   :  { %1609 = vmatpush3.bf16.msra.mxu1 %v1838_v50 }
 0x273   :  { %1610 = vmatprep.subr.bf16.mxu1 %v1866_v61 }
 0x276   :  { %1611 = vmatpush3.bf16.msra.mxu1 %v1839_v51 }
 0x277   :  { %1612 = vmatprep.subr.bf16.mxu1 %v1866_v61 }
 0x27a   :  { %1613 = vmatpush3.bf16.msra.mxu1 %v1840_v52 }
 0x27b   :  { %1614 = vmatprep.subr.bf16.mxu1 %v1866_v61 }
 0x27e   :  { %1615 = vmatpush3.bf16.msra.mxu1 %v1841_v53 }
 0x27f   :  { %1616 = vmatprep.subr.bf16.mxu1 %v1866_v61 }
 0x282   :  { %1617 = vmatpush3.bf16.msra.mxu1 %v1842_v54 }
 0x283   :  { %1622 = vmatprep.subr.bf16.mxu1 %v1866_v61 }
 0x338   :  { %v1130_v56 = vpop.f32.mrb[4].mxu1 }
 0x339   :  { %v1131_v57 = vadd.f32 %v1506_v55, %v1130_v56  ;;  %v1600_v58 = vpop.f32.mrb[5].mxu1 }
 0x33a   :  { %v1133_v59 = vpop.f32.mrb[6].mxu1 }
 0x33b   :  { %v1136_v60 = vmul.f32 0.5, %v1131_v57  ;;  %v1601_v62 = vpop.f32.mrb[7].mxu1 }
 0x33d   :  { %1857 = vtanh.f32 %v1136_v60 }
 0x347   :  { %v1858_v63 = vpop.eup %1857 }
 0x348   :  { %v1138_v0 = vmul.f32 0.5, %v1858_v63 }
 0x34a   :  { %v1139_v1 = vadd.f32 0.5, %v1138_v0 }
 0x34c   :  { %v1140_v3 = vpack.c.bf16 %v1139_v1, %v1139_v1 }
 0x34e   :  { %1619 = vmatmul.mubr.bf16.vlgmr.msra.gmra.mrb[8].mxu1 %v1140_v3 }
 0x34f   :  { %1623 = vmatpush3.bf16.msra.mxu1 %v1843_v2  ;;  %1638 = vmatprep.mubr.msk.bf16.mxu1 %vm1867_vm1, %v1866_v61 }
 0x350   :  { %1624 = vmatprep.subr.bf16.mxu1 %v1866_v61 }
 0x353   :  { %1625 = vmatpush3.bf16.msra.mxu1 %v1844_v4 }
 0x354   :  { %1626 = vmatprep.subr.bf16.mxu1 %v1866_v61 }
 0x357   :  { %1627 = vmatpush3.bf16.msra.mxu1 %v1845_v5 }
 0x358   :  { %1628 = vmatprep.subr.bf16.mxu1 %v1866_v61 }
 0x35b   :  { %1629 = vmatpush3.bf16.msra.mxu1 %v1846_v6 }
 0x35c   :  { %1630 = vmatprep.subr.bf16.mxu1 %v1866_v61 }
 0x35f   :  { %1631 = vmatpush3.bf16.msra.mxu1 %v1847_v7 }
 0x360   :  { %1632 = vmatprep.subr.bf16.mxu1 %v1866_v61 }
 0x363   :  { %1633 = vmatpush3.bf16.msra.mxu1 %v1848_v8 }
 0x364   :  { %1634 = vmatprep.subr.bf16.mxu1 %v1866_v61 }
 0x367   :  { %1635 = vmatpush3.bf16.msra.mxu1 %v1849_v9 }
 0x368   :  { %1636 = vmatprep.subr.bf16.mxu1 %v1866_v61 }
 0x36b   :  { %1637 = vmatpush3.bf16.msra.mxu1 %v1850_v10 }
 0x421   :  { %v1246_v12 = vpop.f32.mrb[8].mxu1 }
 0x422   :  { %v1247_v13 = vadd.f32 %v1515_v11, %v1246_v12  ;;  %v1620_v14 = vpop.f32.mrb[9].mxu1 }
 0x423   :  { %v1249_v15 = vpop.f32.mrb[10].mxu1 }
 0x424   :  { %v1252_v16 = vmul.f32 0.5, %v1247_v13  ;;  %v1621_v17 = vpop.f32.mrb[11].mxu1 }
 0x426   :  { %1859 = vtanh.f32 %v1252_v16 }
 0x430   :  { %v1860_v18 = vpop.eup %1859 }
 0x431   :  { %v1254_v19 = vmul.f32 0.5, %v1860_v18 }
 0x433   :  { %v1255_v20 = vadd.f32 0.5, %v1254_v19 }
 0x435   :  { %v1256_v61 = vpack.c.bf16 %v1255_v20, %v1255_v20 }
 0x437   :  { %1639 = vmatmul.mubr.bf16.vlgmr.msra.gmra.mrb[12].mxu1 %v1256_v61 }
 0x50a   :  { %v1362_v22 = vpop.f32.mrb[12].mxu1 }
 0x50b   :  { %v1363_v23 = vadd.f32 %v1524_v21, %v1362_v22  ;;  %v1640_v24 = vpop.f32.mrb[13].mxu1 }
 0x50c   :  { %v1365_v25 = vpop.f32.mrb[14].mxu1 }
 0x50d   :  { %1368 = vmax.xlane.f32.xlu0 %v1363_v23  ;;  %v1641_v26 = vpop.f32.mrb[15].mxu1 }
 0x59a   :  { %v1369_v27 = vpop.xlane.xlu0 %1368 }
 0x59b   :  { %v1370_v28 = vsub.f32 %v1363_v23, %v1369_v27 }
 0x59d   :  { %v1371_v29 = vmul.f32 1.442695, %v1370_v28 }
 0x59f   :  { %1861 = vpow2.f32 %v1371_v29 }
 0x5a9   :  { %v1862_v30 = vpop.eup %1861 }
 0x5aa   :  { %1373 = vadd.xlane.f32.xlu0 %v1862_v30 }
 0x637   :  { %v1374_v31 = vpop.xlane.xlu0 %1373 }
 0x638   :  { %1863 = vrcp.f32 %v1374_v31 }
 0x642   :  { %v1864_v32 = vpop.eup %1863 }
 0x643   :  { %v1376_v33 = vmul.f32 %v1864_v32, %v1862_v30 }
 0x645   :  { %v1377_v34 = vpack.c.bf16 %v1376_v33, %v1376_v33 }
 0x647   :  { %1378 = vst [vmem:[%s2425_s11] sm:$0xf] %v1377_v34 }

</bundles_post_ra>
